<compile_context>
chip_gen: v5e
topology: v5e:2x2
jax: 0.10.0
libtpu: 0.0.40
codegen_flags: <defaults>
</compile_context>

<pallas_src>
import jax
import jax.numpy as jnp
from jax import lax
from jax.experimental import pallas as pl
from jax.experimental.pallas import tpu as pltpu


def _round_up(x, m):
    return (x + m - 1) // m * m


def _vmem_budget_bytes(default_bytes=32 * 2 ** 20):
    """Generation-aware VMEM budget (~45% of physical), conservative fallback."""
    try:
        cap = int(pltpu.get_tpu_info().vmem_capacity_bytes)
        return max(default_bytes, int(cap * 0.45))
    except Exception:
        return default_bytes


# ----------------------------- query-build kernel -----------------------------
# q = [ e1_r*rel_r - e1_i*rel_i | e1_r*rel_i + e1_i*rel_r ], built once per
# forward (hoisted out of the entity-tiled score grid), tiled over the batch.

def _complex_query_kernel(e1r_ref, e1i_ref, rr_ref, ri_ref, q_ref):
    e1r = e1r_ref[...].astype(jnp.float32)
    e1i = e1i_ref[...].astype(jnp.float32)
    rr = rr_ref[...].astype(jnp.float32)
    ri = ri_ref[...].astype(jnp.float32)
    e = e1r.shape[1]
    # Direct lane-dense slice stores (no in-kernel concatenate / relayout).
    q_ref[:, :e] = (e1r * rr - e1i * ri).astype(q_ref.dtype)
    q_ref[:, e:] = (e1r * ri + e1i * rr).astype(q_ref.dtype)


def build_query(e1_real, e1_img, rel_real, rel_img, *, tile_b,
                out_dtype=jnp.bfloat16):
    bp, e = e1_real.shape
    assert bp % tile_b == 0
    in_spec = pl.BlockSpec((tile_b, e), lambda i: (i, 0))
    out_spec = pl.BlockSpec((tile_b, 2 * e), lambda i: (i, 0))
    return pl.pallas_call(
        _complex_query_kernel,
        out_shape=jax.ShapeDtypeStruct((bp, 2 * e), out_dtype),
        grid_spec=pltpu.PrefetchScalarGridSpec(
            num_scalar_prefetch=0,
            grid=(bp // tile_b,),
            in_specs=[in_spec, in_spec, in_spec, in_spec],
            out_specs=out_spec,
        ),
        compiler_params=pltpu.CompilerParams(
            dimension_semantics=("parallel",),
        ),
    )(e1_real, e1_img, rel_real, rel_img)


# -------------------------------- score kernel --------------------------------
# pred_tile = sigmoid(q_tile @ w_tile.T): the entity table stays in its natural
# [N, 2E] row layout (no per-call HBM transpose); the MXU contracts over the
# shared last dim (trans_b), accumulating in f32.

def _complex_score_kernel(q_ref, w_ref, out_ref):
    s = lax.dot_general(
        q_ref[...], w_ref[...],
        dimension_numbers=(((1,), (1,)), ((), ())),
        preferred_element_type=jnp.float32)
    # sigmoid(x) == 0.5 * (tanh(x/2) + 1): one EUP transcendental, no divide.
    out_ref[...] = (0.5 * jnp.tanh(0.5 * s) + 0.5).astype(out_ref.dtype)


def complex_score(q, w, *, tile_b, tile_n, out_dtype=jnp.float32,
                  vmem_limit_bytes=None):
    """scores = sigmoid(q @ w.T), tiled over (batch, entity) blocks.

    q : [Bp, K] bf16 (batch already padded to a multiple of tile_b)
    w : [Np, K] bf16 (entities already padded to a multiple of tile_n)
    """
    bp, k = q.shape
    n_pad, kw = w.shape
    assert k == kw and bp % tile_b == 0 and n_pad % tile_n == 0
    if vmem_limit_bytes is None:
        vmem_limit_bytes = _vmem_budget_bytes()
    return pl.pallas_call(
        _complex_score_kernel,
        out_shape=jax.ShapeDtypeStruct((bp, n_pad), out_dtype),
        grid_spec=pltpu.PrefetchScalarGridSpec(
            num_scalar_prefetch=0,
            grid=(bp // tile_b, n_pad // tile_n),
            in_specs=[
                pl.BlockSpec((tile_b, k), lambda i, j: (i, 0)),
                pl.BlockSpec((tile_n, k), lambda i, j: (j, 0)),
            ],
            out_specs=pl.BlockSpec((tile_b, tile_n), lambda i, j: (i, j)),
        ),
        compiler_params=pltpu.CompilerParams(
            dimension_semantics=("parallel", "parallel"),
            vmem_limit_bytes=int(vmem_limit_bytes),
        ),
    )(q, w)


# ------------------------- one-time entity-table cache -------------------------

def prepare_entity_cache(params, *, tile_n=1024, tile_b=512,
                         table_dtype=jnp.bfloat16):
    """Build the scoring table ONCE (per weight update), not per forward.

    Concatenates [E_real | E_img] along the embedding dim into a single bf16
    [N_pad, 2*E_pad] table in its natural row layout, pads the contraction dim
    to a multiple of 128 (full MXU feed) and the entity dim to a multiple of
    the chosen entity tile.  The entity tile is clamped so the double-buffered
    score working set fits the generation-aware VMEM budget.
    """
    wr = params["emb_e_real"]
    wi = params["emb_e_img"]
    n_ent, emb_dim = wr.shape
    e_pad = _round_up(emb_dim, 128)
    k = 2 * e_pad

    budget = _vmem_budget_bytes()
    tn = min(tile_n, _round_up(n_ent, 128))

    def working_set(tn_):  # double-buffered q/w/out blocks (f32 out, worst case)
        return 2 * (tile_b * k * 2 + tn_ * k * 2 + tile_b * tn_ * 4)

    while tn > 128 and working_set(tn) > budget:
        tn = _round_up(tn // 2, 128)

    n_pad = _round_up(n_ent, tn)

    def prep(t):
        t = t.astype(table_dtype)
        pr, pc = n_pad - n_ent, e_pad - emb_dim
        if pr or pc:
            t = jnp.pad(t, ((0, pr), (0, pc)))
        return t

    w_cat = jnp.concatenate([prep(wr), prep(wi)], axis=1)       # [N_pad, 2*E_pad]
    return {
        "w": w_cat,
        "num_entities": n_ent,
        "emb_dim": emb_dim,
        "emb_pad": e_pad,
        "tile_n": tn,
        "tile_b": tile_b,
        "vmem_budget": budget,
    }


# ------------------------------- model forward --------------------------------

def complex_forward(params, cache, e1, rel, *, out_dtype=jnp.float32):
    e1_flat = e1.reshape(-1)
    rel_flat = rel.reshape(-1)
    b = e1_flat.shape[0]

    tb = min(cache["tile_b"], _round_up(b, 8))
    bp = _round_up(b, tb)
    e_pad = cache["emb_pad"]

    def gather(table, idx):
        rows = table[idx].astype(jnp.bfloat16)      # bf16 straight through
        pr, pc = bp - rows.shape[0], e_pad - rows.shape[1]
        if pr or pc:
            rows = jnp.pad(rows, ((0, pr), (0, pc)))
        return rows

    # TODO(synk): the four embedding gathers could be fused into build_query via
    # PrefetchScalarGridSpec row index_maps; left as XLA gathers (glue) for now.
    e1r = gather(params["emb_e_real"], e1_flat)
    e1i = gather(params["emb_e_img"], e1_flat)
    rr = gather(params["emb_rel_real"], rel_flat)
    ri = gather(params["emb_rel_img"], rel_flat)

    # TODO(synk): input dropout (inp_drop) skipped — eval mode => identity.

    q = build_query(e1r, e1i, rr, ri, tile_b=tb)                # [Bp, 2*E_pad] bf16
    scores = complex_score(q, cache["w"], tile_b=tb, tile_n=cache["tile_n"],
                           out_dtype=out_dtype,
                           vmem_limit_bytes=cache["vmem_budget"])
    return scores[:b, :cache["num_entities"]]


# --------------------------- param init & reference ---------------------------

def _xavier_normal(key, shape, dtype):
    fan_in, fan_out = shape
    std = jnp.sqrt(2.0 / (fan_in + fan_out))
    return (jax.random.normal(key, shape, jnp.float32) * std).astype(dtype)


def init_params(key, num_entities, num_relations, emb_dim,
                emb_dtype=jnp.bfloat16):
    ks = jax.random.split(key, 4)
    # padding_idx=0 only affects gradients in torch; init() xavier-inits all rows.
    return {
        "emb_e_real":   _xavier_normal(ks[0], (num_entities, emb_dim), emb_dtype),
        "emb_e_img":    _xavier_normal(ks[1], (num_entities, emb_dim), emb_dtype),
        "emb_rel_real": _xavier_normal(ks[2], (num_relations, emb_dim), emb_dtype),
        "emb_rel_img":  _xavier_normal(ks[3], (num_relations, emb_dim), emb_dtype),
    }


def _forward_ref(params, e1, rel):
    """Literal translation of the PyTorch forward (4 matmuls), f32, HIGHEST."""
    e1_flat = e1.reshape(-1)
    rel_flat = rel.reshape(-1)
    e1r = params["emb_e_real"][e1_flat].astype(jnp.float32)
    e1i = params["emb_e_img"][e1_flat].astype(jnp.float32)
    rr = params["emb_rel_real"][rel_flat].astype(jnp.float32)
    ri = params["emb_rel_img"][rel_flat].astype(jnp.float32)
    wr = params["emb_e_real"].astype(jnp.float32)
    wi = params["emb_e_img"].astype(jnp.float32)
    hi = jax.lax.Precision.HIGHEST
    realrealreal = jnp.dot(e1r * rr, wr.T, precision=hi)
    realimgimg = jnp.dot(e1r * ri, wi.T, precision=hi)
    imgrealimg = jnp.dot(e1i * rr, wi.T, precision=hi)
    imgimgreal = jnp.dot(e1i * ri, wr.T, precision=hi)
    return jax.nn.sigmoid(realrealreal + realimgimg + imgrealimg - imgimgreal)


# ------------------------------------ main -------------------------------------

if __name__ == "__main__":
    num_entities = 300        # deliberately not a multiple of 128 (pads to tiles)
    num_relations = 16
    emb_dim = 128
    batch = 8

    key = jax.random.PRNGKey(0)
    k_param, k_e1, k_rel = jax.random.split(key, 3)
    params = init_params(k_param, num_entities, num_relations, emb_dim)
    cache = prepare_entity_cache(params)   # one-time prep, reused across steps

    e1 = jax.random.randint(k_e1, (batch, 1), 0, num_entities, jnp.int32)
    rel = jax.random.randint(k_rel, (batch, 1), 0, num_relations, jnp.int32)

    pred = complex_forward(params, cache, e1, rel)
    pred = jax.block_until_ready(pred)

    ref = _forward_ref(params, e1, rel)
    assert pred.shape == (batch, num_entities), pred.shape
    # bf16 operands (f32 accumulation) in the kernel vs f32 reference.
    assert jnp.allclose(pred, ref, atol=5e-3, rtol=5e-3), \
        float(jnp.max(jnp.abs(pred - ref)))

    print("KERNEL_OK")
</pallas_src>

<mosaic_0001>
module attributes {stable_mosaic.version = 11 : i64} {
  func.func @_complex_query_kernel(%arg0: i32, %arg1: memref<8x128xbf16, #tpu.memory_space<vmem>>, %arg2: memref<8x128xbf16, #tpu.memory_space<vmem>>, %arg3: memref<8x128xbf16, #tpu.memory_space<vmem>>, %arg4: memref<8x128xbf16, #tpu.memory_space<vmem>>, %arg5: memref<8x256xbf16, #tpu.memory_space<vmem>>) attributes {dimension_semantics = [#tpu.dimension_semantics<parallel>], iteration_bounds = array<i64: 1>, scalar_prefetch = 0 : i64, scratch_operands = 0 : i64, tpu.core_type = #tpu.core_type<tc>, window_params = [{transform_indices = @transform_0, window_bounds = array<i64: 8, 128>}, {transform_indices = @transform_1, window_bounds = array<i64: 8, 128>}, {transform_indices = @transform_2, window_bounds = array<i64: 8, 128>}, {transform_indices = @transform_3, window_bounds = array<i64: 8, 128>}, {transform_indices = @transform_4, window_bounds = array<i64: 8, 256>}]} {
    %c0 = arith.constant 0 : index
    %c0_0 = arith.constant 0 : index
    %0 = vector.load %arg1[%c0, %c0_0] : memref<8x128xbf16, #tpu.memory_space<vmem>>, vector<8x128xbf16>
    %1 = arith.extf %0 : vector<8x128xbf16> to vector<8x128xf32>
    %c0_1 = arith.constant 0 : index
    %c0_2 = arith.constant 0 : index
    %2 = vector.load %arg2[%c0_1, %c0_2] : memref<8x128xbf16, #tpu.memory_space<vmem>>, vector<8x128xbf16>
    %3 = arith.extf %2 : vector<8x128xbf16> to vector<8x128xf32>
    %c0_3 = arith.constant 0 : index
    %c0_4 = arith.constant 0 : index
    %4 = vector.load %arg3[%c0_3, %c0_4] : memref<8x128xbf16, #tpu.memory_space<vmem>>, vector<8x128xbf16>
    %5 = arith.extf %4 : vector<8x128xbf16> to vector<8x128xf32>
    %c0_5 = arith.constant 0 : index
    %c0_6 = arith.constant 0 : index
    %6 = vector.load %arg4[%c0_5, %c0_6] : memref<8x128xbf16, #tpu.memory_space<vmem>>, vector<8x128xbf16>
    %7 = arith.extf %6 : vector<8x128xbf16> to vector<8x128xf32>
    %8 = arith.mulf %1, %5 : vector<8x128xf32>
    %9 = arith.mulf %3, %7 : vector<8x128xf32>
    %10 = arith.subf %8, %9 : vector<8x128xf32>
    %11 = arith.truncf %10 : vector<8x128xf32> to vector<8x128xbf16>
    %c0_7 = arith.constant 0 : index
    %c0_8 = arith.constant 0 : index
    %12 = vector.load %arg5[%c0_7, %c0_8] : memref<8x256xbf16, #tpu.memory_space<vmem>>, vector<8x128xbf16>
    tpu.vector_store %arg5[%c0_7, %c0_8], %11 {strides = array<i32>} : memref<8x256xbf16, #tpu.memory_space<vmem>>, vector<8x128xbf16>,
    %13 = arith.mulf %1, %7 : vector<8x128xf32>
    %14 = arith.mulf %3, %5 : vector<8x128xf32>
    %15 = arith.addf %13, %14 : vector<8x128xf32>
    %16 = arith.truncf %15 : vector<8x128xf32> to vector<8x128xbf16>
    %c0_9 = arith.constant 0 : index
    %c128 = arith.constant 128 : index
    %17 = vector.load %arg5[%c0_9, %c128] : memref<8x256xbf16, #tpu.memory_space<vmem>>, vector<8x128xbf16>
    tpu.vector_store %arg5[%c0_9, %c128], %16 {strides = array<i32>} : memref<8x256xbf16, #tpu.memory_space<vmem>>, vector<8x128xbf16>,
    return
  }
  func.func @transform_0(%arg0: i32) -> (i32, i32) {
    %c0_i32 = arith.constant 0 : i32
    %c0_i32_0 = arith.constant 0 : i32
    return %arg0, %c0_i32 : i32, i32
  }
  func.func @transform_1(%arg0: i32) -> (i32, i32) {
    %c0_i32 = arith.constant 0 : i32
    %c0_i32_0 = arith.constant 0 : i32
    return %arg0, %c0_i32 : i32, i32
  }
  func.func @transform_2(%arg0: i32) -> (i32, i32) {
    %c0_i32 = arith.constant 0 : i32
    %c0_i32_0 = arith.constant 0 : i32
    return %arg0, %c0_i32 : i32, i32
  }
  func.func @transform_3(%arg0: i32) -> (i32, i32) {
    %c0_i32 = arith.constant 0 : i32
    %c0_i32_0 = arith.constant 0 : i32
    return %arg0, %c0_i32 : i32, i32
  }
  func.func @transform_4(%arg0: i32) -> (i32, i32) {
    %c0_i32 = arith.constant 0 : i32
    %c0_i32_0 = arith.constant 0 : i32
    return %arg0, %c0_i32 : i32, i32
  }
}

</mosaic_0001>

<bundles_post_ra>
// kernel: tpu_custom_call.1
= control target key start
LH: loop header
LB: loop body
LE: loop exit
PB: predicated region body
PF: predicated region fallthrough
CT: control target
= control target key end

     0   :  { %9 = vsyncpa [#allocation3], 0  ;;  %s288_s0 = inlined_call_operand.hbm [shape: bf16[8,128], index: 0, kind: input, shape index: {}]   ;;  %s289_s1 = inlined_call_operand.hbm [shape: bf16[8,128], index: 1, kind: input, shape index: {}]   ;;  %s290_s2 = inlined_call_operand.hbm [shape: bf16[8,128], index: 2, kind: input, shape index: {}]   ;;  %s291_s3 = inlined_call_operand.hbm [shape: bf16[8,128], index: 3, kind: input, shape index: {}]   ;;  %s292_s4 = inlined_call_operand.hbm [shape: bf16[8,256], index: 4, kind: output, shape index: {}]  }
   0x1   :  { %10 = vsyncpa [#allocation6], 0 }
   0x2   :  { %11 = vsyncpa [#allocation9], 0  ;;  %s29_s17 = sshll.u32 %s289_s1, 4  ;;  %s30_s17 = int_to_ptr.hbm [resolvable:$true] %s29_s17 }
   0x3   :  { %12 = vsyncpa [#allocation4], 0  ;;  %s243_s18 = smov [#allocation5]   ;;  %s18_s22 = sshll.u32 %s288_s0, 4  ;;  %s19_s22 = int_to_ptr.hbm [resolvable:$true] %s18_s22 }
   0x4   :  { %s31_s19 = sshll.u32 %s243_s18, 4  ;;  %s244_s23 = smov [#allocation2]   ;;  %s32_s19 = int_to_ptr.vmem [resolvable:$true] %s31_s19 }
   0x5   :  { %34 = dma.hbm_to_vmem [thread:$0]  %s30_s17, 64, %s32_s19, [#allocation6]  }
   0x6   :  { %s20_s24 = sshll.u32 %s244_s23, 4  ;;  %s40_s27 = sshll.u32 %s290_s2, 4  ;;  %s21_s24 = int_to_ptr.vmem [resolvable:$true] %s20_s24  ;;  %s41_s27 = int_to_ptr.hbm [resolvable:$true] %s40_s27 }
   0x7   :  { %23 = dma.hbm_to_vmem [thread:$0]  %s19_s22, 64, %s21_s24, [#allocation3]  }
   0x8   :  { %s51_s29 = sshll.u32 %s291_s3, 4  ;;  %s245_s30 = smov [#allocation7]   ;;  %s52_s29 = int_to_ptr.hbm [resolvable:$true] %s51_s29 }
   0x9   :  { %s42_s5 = sshll.u32 %s245_s30, 4  ;;  %s246_s0 = smov [#allocation8]   ;;  %s43_s5 = int_to_ptr.vmem [resolvable:$true] %s42_s5 }
   0xa   :  { %45 = dma.hbm_to_vmem [thread:$0]  %s41_s27, 64, %s43_s5, [#allocation6]  }
   0xb   :  { %s53_s6 = sshll.u32 %s246_s0, 4  ;;  %s54_s6 = int_to_ptr.vmem [resolvable:$true] %s53_s6 }
   0xc   :  { %56 = dma.hbm_to_vmem [thread:$0]  %s52_s29, 64, %s54_s6, [#allocation9]  }
   0xd   :  { %235 = dma.done.wait [#allocation3], 64  }
   0xe   :  { %236 = vsyncadd [#allocation3], 4294967232 }
   0xf   :  { %237 = dma.done.wait [#allocation6], 128  }
  0x10   :  { %238 = vsyncadd [#allocation6], 4294967168 }
  0x11   :  { %239 = dma.done.wait [#allocation9], 64  }
  0x12   :  { %240 = vsyncadd [#allocation9], 4294967232  ;;  %v73_v0 = vld [vmem:[#allocation2] sm:$0xf]  ;;  %v75_v1 = vld [vmem:[#allocation5] sm:$0xf] }
  0x13   :  { %v77_v2 = vld [vmem:[#allocation7] sm:$0xf]  ;;  %v74_v3 = vunpack.c.l.bf16 %v73_v0  ;;  %v76_v4 = vunpack.c.l.bf16 %v75_v1  ;;  %v79_v6 = vld [vmem:[#allocation8] sm:$0xf]  ;;  %s247_s2 = smov [#allocation10]   ;;  %s98_s9 = sshll.u32 %s292_s4, 4  ;;  %s99_s9 = int_to_ptr.hbm [resolvable:$true] %s98_s9 }
  0x14   :  { %v78_v5 = vunpack.c.l.bf16 %v77_v2  ;;  %v80_v7 = vunpack.c.l.bf16 %v79_v6  ;;  %s96_s3 = sshll.u32 %s247_s2, 4  ;;  %s97_s3 = int_to_ptr.vmem [resolvable:$true] %s96_s3 }
  0x16   :  { %v81_v8 = vmul.f32 %v78_v5, %v74_v3  ;;  %v87_v9 = vmul.f32 %v78_v5, %v76_v4  ;;  %v82_v10 = vmul.f32 %v80_v7, %v76_v4  ;;  %v86_v11 = vmul.f32 %v80_v7, %v74_v3 }
  0x18   :  { %v83_v12 = vsub.f32 %v81_v8, %v82_v10  ;;  %v88_v13 = vadd.f32 %v87_v9, %v86_v11 }
  0x1a   :  { %v84_v14 = vpack.c.bf16 %v83_v12, %v83_v12  ;;  %v89_v15 = vpack.c.bf16 %v88_v13, %v88_v13 }
  0x1c   :  { %85 = vst [vmem:[#allocation10] sm:$0xf] %v84_v14 }
  0x1d   :  { %90 = vst [vmem:[#allocation10 + $0x4] sm:$0xf] %v89_v15 }
  0x1e   :  { %101 = dma.vmem_to_hbm [thread:$0]  %s97_s3, 128, %s99_s9, [#allocation4]  }
  0x1f   :  { %241 = dma.done.wait [#allocation4], 128  }
  0x20   :  { %242 = vsyncadd [#allocation4], 4294967168 }
  0x21   :  { %106 = vsyncpa [#allocation3], 1 }
  0x22   :  { %107 = vsyncpa [#allocation6], 1 }
  0x23   :  { %108 = vsyncpa [#allocation9], 1 }
  0x24   :  { %109 = vsyncpa [#allocation4], 1 }

</bundles_post_ra>
